<compile_context>
chip_gen: v5e
topology: v5e:2x2
jax: 0.10.0
libtpu: 0.0.40
codegen_flags: <defaults>
</compile_context>

<pallas_src>
import functools
import math

import jax
import jax.numpy as jnp
from jax.experimental import pallas as pl

# ---------------- config ----------------
D_MODEL = 32
N_HEADS = 4
D_K = 8
D_V = 8
BATCH = 2
SEQ = 8


# ---------------- single fused kernel ----------------
def mha_kernel(xq_ref, xk_ref, xv_ref, wq_ref, wk_ref, wv_ref, wfc_ref,
               mask_ref, out_ref, attn_ref, *, batch, seq, n_heads, d_k, d_v):
    B, S, H = batch, seq, n_heads

    xq = xq_ref[...]                                  # (B*S, d_model), also residual
    xk = xk_ref[...]
    xv = xv_ref[...]

    # ---- head-major Q/K/V projections --------------------------------------
    # Weights arrive as (H, d_model, d_head): slicing wq_ref[h] is a leading-
    # dim (tile) offset, never a lane slice.  The 1/sqrt(d_k) scale is already
    # folded into W_Q on the host (hoisted out of the kernel).
    q_list, k_list, v_list = [], [], []
    for h in range(H):
        q_h = jnp.dot(xq, wq_ref[h], preferred_element_type=jnp.float32)   # (B*S, d_k)
        k_h = jnp.dot(xk, wk_ref[h], preferred_element_type=jnp.float32)
        v_h = jnp.dot(xv, wv_ref[h], preferred_element_type=jnp.float32)
        # (B*S, d) -> (B, S, d): splits the sublane axis exactly on an 8-row
        # tile boundary — a free leading-dim reshape, no lane relayout.
        q_list.append(q_h.reshape(B, S, d_k))
        k_list.append(k_h.reshape(B, S, d_k))
        v_list.append(v_h.reshape(B, S, d_v))

    # Stack heads along the leading (tile) dim; row order is hb = h*B + b.
    q_all = jnp.concatenate(q_list, axis=0)           # (H*B, S, d_k)
    k_all = jnp.concatenate(k_list, axis=0)           # (H*B, S, d_k)
    v_all = jnp.concatenate(v_list, axis=0)           # (H*B, S, d_v)

    # ---- batched scores + ONE softmax over all (h, b) rows -----------------
    scores = jnp.einsum('bqd,bkd->bqk', q_all, k_all,
                        preferred_element_type=jnp.float32)        # (H*B, S, S)
    # Exact masked_fill_(-1e9) semantics (incl. uniform softmax on fully
    # masked rows), applied once over the whole batched tensor.
    scores = jnp.where(mask_ref[...] != 0, jnp.float32(-1e9), scores)
    scores = scores - jnp.max(scores, axis=-1, keepdims=True)
    e = jnp.exp(scores)
    # Exact divide (not approx reciprocal) so attention weights match the
    # reference tightly.
    attn = e / jnp.sum(e, axis=-1, keepdims=True)                  # (H*B, S, S)

    # ---- batched P @ V ------------------------------------------------------
    ctx = jnp.einsum('bqk,bkd->bqd', attn, v_all,
                     preferred_element_type=jnp.float32)           # (H*B, S, d_v)

    # ---- output projection accumulated per head (no ctx VMEM scratch) ------
    y = xq                                            # residual
    for h in range(H):
        ctx_h = ctx[h * B:(h + 1) * B].reshape(B * S, d_v)          # free reshape
        y = y + jnp.dot(ctx_h, wfc_ref[h], preferred_element_type=jnp.float32)

    # ---- LayerNorm (fresh nn.LayerNorm: gamma=1, beta=0, eps=1e-5, biased var)
    mean = jnp.mean(y, axis=-1, keepdims=True)
    var = jnp.mean((y - mean) ** 2, axis=-1, keepdims=True)
    out_ref[...] = (y - mean) * jax.lax.rsqrt(var + 1e-5)

    # ---- lane-dense attention output: (S, H*B*S) = (8, 64), one sublane tile
    for i in range(H * B):
        attn_ref[:, i * S:(i + 1) * S] = attn[i]


# ---------------- full MultiHeadAttention forward ----------------
@jax.jit
def multi_head_attention(params, input_Q, input_K, input_V, attn_mask):
    """params: nn.Linear-convention weights (out_features, in_features), bias-free.
    input_*: (B, S, d_model) float32.  attn_mask: (B, S, S) bool/int, True = masked.
    Returns (output (B, S, d_model), attn (B, H, S, S))."""
    B, S, _ = input_Q.shape
    H, dk, dv = N_HEADS, D_K, D_V

    xq = input_Q.reshape(B * S, D_MODEL)
    xk = input_K.reshape(B * S, D_MODEL)
    xv = input_V.reshape(B * S, D_MODEL)

    inv_sqrt_dk = 1.0 / math.sqrt(dk)
    # nn.Linear weight (out, in) -> per-head (H, d_model, d_head); hoist the
    # 1/sqrt(d_k) scale into W_Q so the kernel never multiplies by it.
    wq3 = params["W_Q"].reshape(H, dk, D_MODEL).transpose(0, 2, 1) * inv_sqrt_dk
    wk3 = params["W_K"].reshape(H, dk, D_MODEL).transpose(0, 2, 1)
    wv3 = params["W_V"].reshape(H, dv, D_MODEL).transpose(0, 2, 1)
    wfc3 = params["fc"].T.reshape(H, dv, D_MODEL)

    # mask replicated per head, rows ordered hb = h*B + b (h-major), as f32 0/1.
    mask_hb = jnp.tile(attn_mask.astype(jnp.float32), (H, 1, 1))    # (H*B, S, S)

    kernel = functools.partial(mha_kernel, batch=B, seq=S,
                               n_heads=H, d_k=dk, d_v=dv)

    def full(shape):
        return pl.BlockSpec(shape, lambda: (0,) * len(shape))

    out2d, attn2d = pl.pallas_call(
        kernel,
        out_shape=(jax.ShapeDtypeStruct((B * S, D_MODEL), jnp.float32),
                   jax.ShapeDtypeStruct((S, H * B * S), jnp.float32)),
        in_specs=[
            full((B * S, D_MODEL)),        # xq (also residual)
            full((B * S, D_MODEL)),        # xk
            full((B * S, D_MODEL)),        # xv
            full((H, D_MODEL, dk)),        # W_Q (per-head, pre-scaled)
            full((H, D_MODEL, dk)),        # W_K (per-head)
            full((H, D_MODEL, dv)),        # W_V (per-head)
            full((H, dv, D_MODEL)),        # fc (per-head)
            full((H * B, S, S)),           # mask (replicated per head)
        ],
        out_specs=(full((B * S, D_MODEL)),
                   full((S, H * B * S))),
    )(xq, xk, xv, wq3, wk3, wv3, wfc3, mask_hb)

    out = out2d.reshape(B, S, D_MODEL)
    # (S, H*B*S) lane-dense slab -> (B, H, S, S) contract, undone in the wrapper.
    attn = attn2d.reshape(S, H, B, S).transpose(2, 1, 0, 3)
    return out, attn


# ---------------- pure-JAX reference (for sanity check) ----------------
def reference(params, input_Q, input_K, input_V, attn_mask):
    B, S, _ = input_Q.shape
    Q = (input_Q @ params["W_Q"].T).reshape(B, S, N_HEADS, D_K).transpose(0, 2, 1, 3)
    K = (input_K @ params["W_K"].T).reshape(B, S, N_HEADS, D_K).transpose(0, 2, 1, 3)
    V = (input_V @ params["W_V"].T).reshape(B, S, N_HEADS, D_V).transpose(0, 2, 1, 3)
    scores = jnp.einsum("bhqd,bhkd->bhqk", Q, K) / jnp.sqrt(jnp.float32(D_K))
    scores = jnp.where(attn_mask[:, None, :, :], -1e9, scores)
    attn = jax.nn.softmax(scores, axis=-1)
    ctx = jnp.einsum("bhqk,bhkd->bhqd", attn, V)
    ctx = ctx.transpose(0, 2, 1, 3).reshape(B, S, N_HEADS * D_V)
    out = ctx @ params["fc"].T + input_Q
    mean = jnp.mean(out, axis=-1, keepdims=True)
    var = jnp.mean((out - mean) ** 2, axis=-1, keepdims=True)
    return (out - mean) / jnp.sqrt(var + 1e-5), attn


if __name__ == "__main__":
    key = jax.random.PRNGKey(0)
    k_wq, k_wk, k_wv, k_fc, k_q, k_k, k_v = jax.random.split(key, 7)

    # nn.Linear weight shape = (out_features, in_features), bias=False
    scale = 0.05
    params = {
        "W_Q": scale * jax.random.normal(k_wq, (D_K * N_HEADS, D_MODEL), jnp.float32),
        "W_K": scale * jax.random.normal(k_wk, (D_K * N_HEADS, D_MODEL), jnp.float32),
        "W_V": scale * jax.random.normal(k_wv, (D_V * N_HEADS, D_MODEL), jnp.float32),
        "fc": scale * jax.random.normal(k_fc, (D_MODEL, D_V * N_HEADS), jnp.float32),
    }

    input_Q = jax.random.normal(k_q, (BATCH, SEQ, D_MODEL), jnp.float32)
    input_K = jax.random.normal(k_k, (BATCH, SEQ, D_MODEL), jnp.float32)
    input_V = jax.random.normal(k_v, (BATCH, SEQ, D_MODEL), jnp.float32)

    # padding-style mask: key positions >= 6 are masked (True = masked)
    key_pad = jnp.arange(SEQ) >= 6                       # (S,)
    attn_mask = jnp.broadcast_to(key_pad[None, None, :], (BATCH, SEQ, SEQ))

    out, attn = multi_head_attention(params, input_Q, input_K, input_V, attn_mask)
    out = jax.block_until_ready(out)
    attn = jax.block_until_ready(attn)

    ref_out, ref_attn = reference(params, input_Q, input_K, input_V, attn_mask)
    assert out.shape == (BATCH, SEQ, D_MODEL)
    assert attn.shape == (BATCH, N_HEADS, SEQ, SEQ)
    assert jnp.allclose(out, ref_out, atol=2e-4, rtol=2e-4)
    assert jnp.allclose(attn, ref_attn, atol=2e-5, rtol=2e-5)

    print("KERNEL_OK")
</pallas_src>

<mosaic_0001>
module attributes {stable_mosaic.version = 11 : i64} {
  func.func @mha_kernel(%arg0: memref<16x32xf32, #tpu.memory_space<vmem>>, %arg1: memref<16x32xf32, #tpu.memory_space<vmem>>, %arg2: memref<16x32xf32, #tpu.memory_space<vmem>>, %arg3: memref<4x32x8xf32, #tpu.memory_space<vmem>>, %arg4: memref<4x32x8xf32, #tpu.memory_space<vmem>>, %arg5: memref<4x32x8xf32, #tpu.memory_space<vmem>>, %arg6: memref<4x8x32xf32, #tpu.memory_space<vmem>>, %arg7: memref<8x8x8xf32, #tpu.memory_space<vmem>>, %arg8: memref<16x32xf32, #tpu.memory_space<vmem>>, %arg9: memref<8x64xf32, #tpu.memory_space<vmem>>) attributes {dimension_semantics = [], scalar_prefetch = 0 : i64, scratch_operands = 0 : i64, tpu.core_type = #tpu.core_type<tc>} {
    %c0 = arith.constant 0 : index
    %c0_0 = arith.constant 0 : index
    %0 = vector.load %arg0[%c0, %c0_0] : memref<16x32xf32, #tpu.memory_space<vmem>>, vector<16x32xf32>
    %c0_1 = arith.constant 0 : index
    %c0_2 = arith.constant 0 : index
    %1 = vector.load %arg1[%c0_1, %c0_2] : memref<16x32xf32, #tpu.memory_space<vmem>>, vector<16x32xf32>
    %c0_3 = arith.constant 0 : index
    %c0_4 = arith.constant 0 : index
    %2 = vector.load %arg2[%c0_3, %c0_4] : memref<16x32xf32, #tpu.memory_space<vmem>>, vector<16x32xf32>
    %c0_5 = arith.constant 0 : index
    %c0_6 = arith.constant 0 : index
    %c0_7 = arith.constant 0 : index
    %3 = vector.load %arg3[%c0_5, %c0_6, %c0_7] : memref<4x32x8xf32, #tpu.memory_space<vmem>>, vector<1x32x8xf32>
    %4 = vector.shape_cast %3 : vector<1x32x8xf32> to vector<32x8xf32>
    %cst = arith.constant dense<0.000000e+00> : vector<16x8xf32>
    %5 = tpu.matmul %0, %4, %cst {dimension_numbers = #tpu.dot_dimension_numbers<[1], [0], [0], [1], [0, 0, 1, 1], [], []>} : vector<16x32xf32>, vector<32x8xf32>, vector<16x8xf32> -> vector<16x8xf32>
    %c0_8 = arith.constant 0 : index
    %c0_9 = arith.constant 0 : index
    %c0_10 = arith.constant 0 : index
    %6 = vector.load %arg4[%c0_8, %c0_9, %c0_10] : memref<4x32x8xf32, #tpu.memory_space<vmem>>, vector<1x32x8xf32>
    %7 = vector.shape_cast %6 : vector<1x32x8xf32> to vector<32x8xf32>
    %cst_11 = arith.constant dense<0.000000e+00> : vector<16x8xf32>
    %8 = tpu.matmul %1, %7, %cst_11 {dimension_numbers = #tpu.dot_dimension_numbers<[1], [0], [0], [1], [0, 0, 1, 1], [], []>} : vector<16x32xf32>, vector<32x8xf32>, vector<16x8xf32> -> vector<16x8xf32>
    %c0_12 = arith.constant 0 : index
    %c0_13 = arith.constant 0 : index
    %c0_14 = arith.constant 0 : index
    %9 = vector.load %arg5[%c0_12, %c0_13, %c0_14] : memref<4x32x8xf32, #tpu.memory_space<vmem>>, vector<1x32x8xf32>
    %10 = vector.shape_cast %9 : vector<1x32x8xf32> to vector<32x8xf32>
    %cst_15 = arith.constant dense<0.000000e+00> : vector<16x8xf32>
    %11 = tpu.matmul %2, %10, %cst_15 {dimension_numbers = #tpu.dot_dimension_numbers<[1], [0], [0], [1], [0, 0, 1, 1], [], []>} : vector<16x32xf32>, vector<32x8xf32>, vector<16x8xf32> -> vector<16x8xf32>
    %12 = vector.shape_cast %5 : vector<16x8xf32> to vector<2x8x8xf32>
    %13 = vector.shape_cast %8 : vector<16x8xf32> to vector<2x8x8xf32>
    %14 = vector.shape_cast %11 : vector<16x8xf32> to vector<2x8x8xf32>
    %c1 = arith.constant 1 : index
    %c0_16 = arith.constant 0 : index
    %c0_17 = arith.constant 0 : index
    %15 = vector.load %arg3[%c1, %c0_16, %c0_17] : memref<4x32x8xf32, #tpu.memory_space<vmem>>, vector<1x32x8xf32>
    %16 = vector.shape_cast %15 : vector<1x32x8xf32> to vector<32x8xf32>
    %cst_18 = arith.constant dense<0.000000e+00> : vector<16x8xf32>
    %17 = tpu.matmul %0, %16, %cst_18 {dimension_numbers = #tpu.dot_dimension_numbers<[1], [0], [0], [1], [0, 0, 1, 1], [], []>} : vector<16x32xf32>, vector<32x8xf32>, vector<16x8xf32> -> vector<16x8xf32>
    %c1_19 = arith.constant 1 : index
    %c0_20 = arith.constant 0 : index
    %c0_21 = arith.constant 0 : index
    %18 = vector.load %arg4[%c1_19, %c0_20, %c0_21] : memref<4x32x8xf32, #tpu.memory_space<vmem>>, vector<1x32x8xf32>
    %19 = vector.shape_cast %18 : vector<1x32x8xf32> to vector<32x8xf32>
    %cst_22 = arith.constant dense<0.000000e+00> : vector<16x8xf32>
    %20 = tpu.matmul %1, %19, %cst_22 {dimension_numbers = #tpu.dot_dimension_numbers<[1], [0], [0], [1], [0, 0, 1, 1], [], []>} : vector<16x32xf32>, vector<32x8xf32>, vector<16x8xf32> -> vector<16x8xf32>
    %c1_23 = arith.constant 1 : index
    %c0_24 = arith.constant 0 : index
    %c0_25 = arith.constant 0 : index
    %21 = vector.load %arg5[%c1_23, %c0_24, %c0_25] : memref<4x32x8xf32, #tpu.memory_space<vmem>>, vector<1x32x8xf32>
    %22 = vector.shape_cast %21 : vector<1x32x8xf32> to vector<32x8xf32>
    %cst_26 = arith.constant dense<0.000000e+00> : vector<16x8xf32>
    %23 = tpu.matmul %2, %22, %cst_26 {dimension_numbers = #tpu.dot_dimension_numbers<[1], [0], [0], [1], [0, 0, 1, 1], [], []>} : vector<16x32xf32>, vector<32x8xf32>, vector<16x8xf32> -> vector<16x8xf32>
    %24 = vector.shape_cast %17 : vector<16x8xf32> to vector<2x8x8xf32>
    %25 = vector.shape_cast %20 : vector<16x8xf32> to vector<2x8x8xf32>
    %26 = vector.shape_cast %23 : vector<16x8xf32> to vector<2x8x8xf32>
    %c2 = arith.constant 2 : index
    %c0_27 = arith.constant 0 : index
    %c0_28 = arith.constant 0 : index
    %27 = vector.load %arg3[%c2, %c0_27, %c0_28] : memref<4x32x8xf32, #tpu.memory_space<vmem>>, vector<1x32x8xf32>
    %28 = vector.shape_cast %27 : vector<1x32x8xf32> to vector<32x8xf32>
    %cst_29 = arith.constant dense<0.000000e+00> : vector<16x8xf32>
    %29 = tpu.matmul %0, %28, %cst_29 {dimension_numbers = #tpu.dot_dimension_numbers<[1], [0], [0], [1], [0, 0, 1, 1], [], []>} : vector<16x32xf32>, vector<32x8xf32>, vector<16x8xf32> -> vector<16x8xf32>
    %c2_30 = arith.constant 2 : index
    %c0_31 = arith.constant 0 : index
    %c0_32 = arith.constant 0 : index
    %30 = vector.load %arg4[%c2_30, %c0_31, %c0_32] : memref<4x32x8xf32, #tpu.memory_space<vmem>>, vector<1x32x8xf32>
    %31 = vector.shape_cast %30 : vector<1x32x8xf32> to vector<32x8xf32>
    %cst_33 = arith.constant dense<0.000000e+00> : vector<16x8xf32>
    %32 = tpu.matmul %1, %31, %cst_33 {dimension_numbers = #tpu.dot_dimension_numbers<[1], [0], [0], [1], [0, 0, 1, 1], [], []>} : vector<16x32xf32>, vector<32x8xf32>, vector<16x8xf32> -> vector<16x8xf32>
    %c2_34 = arith.constant 2 : index
    %c0_35 = arith.constant 0 : index
    %c0_36 = arith.constant 0 : index
    %33 = vector.load %arg5[%c2_34, %c0_35, %c0_36] : memref<4x32x8xf32, #tpu.memory_space<vmem>>, vector<1x32x8xf32>
    %34 = vector.shape_cast %33 : vector<1x32x8xf32> to vector<32x8xf32>
    %cst_37 = arith.constant dense<0.000000e+00> : vector<16x8xf32>
    %35 = tpu.matmul %2, %34, %cst_37 {dimension_numbers = #tpu.dot_dimension_numbers<[1], [0], [0], [1], [0, 0, 1, 1], [], []>} : vector<16x32xf32>, vector<32x8xf32>, vector<16x8xf32> -> vector<16x8xf32>
    %36 = vector.shape_cast %29 : vector<16x8xf32> to vector<2x8x8xf32>
    %37 = vector.shape_cast %32 : vector<16x8xf32> to vector<2x8x8xf32>
    %38 = vector.shape_cast %35 : vector<16x8xf32> to vector<2x8x8xf32>
    %c3 = arith.constant 3 : index
    %c0_38 = arith.constant 0 : index
    %c0_39 = arith.constant 0 : index
    %39 = vector.load %arg3[%c3, %c0_38, %c0_39] : memref<4x32x8xf32, #tpu.memory_space<vmem>>, vector<1x32x8xf32>
    %40 = vector.shape_cast %39 : vector<1x32x8xf32> to vector<32x8xf32>
    %cst_40 = arith.constant dense<0.000000e+00> : vector<16x8xf32>
    %41 = tpu.matmul %0, %40, %cst_40 {dimension_numbers = #tpu.dot_dimension_numbers<[1], [0], [0], [1], [0, 0, 1, 1], [], []>} : vector<16x32xf32>, vector<32x8xf32>, vector<16x8xf32> -> vector<16x8xf32>
    %c3_41 = arith.constant 3 : index
    %c0_42 = arith.constant 0 : index
    %c0_43 = arith.constant 0 : index
    %42 = vector.load %arg4[%c3_41, %c0_42, %c0_43] : memref<4x32x8xf32, #tpu.memory_space<vmem>>, vector<1x32x8xf32>
    %43 = vector.shape_cast %42 : vector<1x32x8xf32> to vector<32x8xf32>
    %cst_44 = arith.constant dense<0.000000e+00> : vector<16x8xf32>
    %44 = tpu.matmul %1, %43, %cst_44 {dimension_numbers = #tpu.dot_dimension_numbers<[1], [0], [0], [1], [0, 0, 1, 1], [], []>} : vector<16x32xf32>, vector<32x8xf32>, vector<16x8xf32> -> vector<16x8xf32>
    %c3_45 = arith.constant 3 : index
    %c0_46 = arith.constant 0 : index
    %c0_47 = arith.constant 0 : index
    %45 = vector.load %arg5[%c3_45, %c0_46, %c0_47] : memref<4x32x8xf32, #tpu.memory_space<vmem>>, vector<1x32x8xf32>
    %46 = vector.shape_cast %45 : vector<1x32x8xf32> to vector<32x8xf32>
    %cst_48 = arith.constant dense<0.000000e+00> : vector<16x8xf32>
    %47 = tpu.matmul %2, %46, %cst_48 {dimension_numbers = #tpu.dot_dimension_numbers<[1], [0], [0], [1], [0, 0, 1, 1], [], []>} : vector<16x32xf32>, vector<32x8xf32>, vector<16x8xf32> -> vector<16x8xf32>
    %48 = vector.shape_cast %41 : vector<16x8xf32> to vector<2x8x8xf32>
    %49 = vector.shape_cast %44 : vector<16x8xf32> to vector<2x8x8xf32>
    %50 = vector.shape_cast %47 : vector<16x8xf32> to vector<2x8x8xf32>
    %51 = tpu.concatenate %12, %24, %36, %48 in 0 : vector<2x8x8xf32>, vector<2x8x8xf32>, vector<2x8x8xf32>, vector<2x8x8xf32> -> vector<8x8x8xf32>
    %52 = tpu.concatenate %13, %25, %37, %49 in 0 : vector<2x8x8xf32>, vector<2x8x8xf32>, vector<2x8x8xf32>, vector<2x8x8xf32> -> vector<8x8x8xf32>
    %53 = tpu.concatenate %14, %26, %38, %50 in 0 : vector<2x8x8xf32>, vector<2x8x8xf32>, vector<2x8x8xf32>, vector<2x8x8xf32> -> vector<8x8x8xf32>
    "tpu.trace_start"() <{level = 10 : i32, message = "bqd,bkd->bqk"}> : () -> ()
    %cst_49 = arith.constant dense<0.000000e+00> : vector<8x8x8xf32>
    %54 = tpu.matmul %51, %52, %cst_49 {dimension_numbers = #tpu.dot_dimension_numbers<[2], [2], [1], [1], [0, 0, 0, 1, 1, 1], [0], [0]>} : vector<8x8x8xf32>, vector<8x8x8xf32>, vector<8x8x8xf32> -> vector<8x8x8xf32>
    "tpu.trace_stop"() : () -> ()
    %c0_50 = arith.constant 0 : index
    %c0_51 = arith.constant 0 : index
    %c0_52 = arith.constant 0 : index
    %55 = vector.load %arg7[%c0_50, %c0_51, %c0_52] : memref<8x8x8xf32, #tpu.memory_space<vmem>>, vector<8x8x8xf32>
    %cst_53 = arith.constant 0.000000e+00 : f32
    %56 = vector.broadcast %cst_53 : f32 to vector<8x8x8xf32>
    %57 = arith.cmpf one, %55, %56 : vector<8x8x8xf32>
    %cst_54 = arith.constant -1.000000e+09 : f32
    %58 = vector.broadcast %cst_54 : f32 to vector<8x8x8xf32>
    %59 = arith.select %57, %58, %54 : vector<8x8x8xi1>, vector<8x8x8xf32>
    %cst_55 = arith.constant dense<0xFF800000> : vector<8x8xf32>
    %60 = vector.multi_reduction <maximumf>, %59, %cst_55 [2] : vector<8x8x8xf32> to vector<8x8xf32>
    %61 = vector.shape_cast %60 : vector<8x8xf32> to vector<8x8x1xf32>
    %62 = vector.broadcast %61 : vector<8x8x1xf32> to vector<8x8x8xf32>
    %63 = arith.subf %59, %62 : vector<8x8x8xf32>
    %64 = math.exp %63 : vector<8x8x8xf32>
    %cst_56 = arith.constant dense<0.000000e+00> : vector<8x8xf32>
    %65 = vector.multi_reduction <add>, %64, %cst_56 [2] : vector<8x8x8xf32> to vector<8x8xf32>
    %66 = vector.shape_cast %65 : vector<8x8xf32> to vector<8x8x1xf32>
    %67 = vector.broadcast %66 : vector<8x8x1xf32> to vector<8x8x8xf32>
    %68 = arith.divf %64, %67 : vector<8x8x8xf32>
    "tpu.trace_start"() <{level = 10 : i32, message = "bqk,bkd->bqd"}> : () -> ()
    %cst_57 = arith.constant dense<0.000000e+00> : vector<8x8x8xf32>
    %69 = tpu.matmul %68, %53, %cst_57 {dimension_numbers = #tpu.dot_dimension_numbers<[2], [1], [1], [2], [0, 0, 0, 1, 1, 2], [0], [0]>} : vector<8x8x8xf32>, vector<8x8x8xf32>, vector<8x8x8xf32> -> vector<8x8x8xf32>
    "tpu.trace_stop"() : () -> ()
    %70 = vector.extract_strided_slice %69 {offsets = [0, 0, 0], sizes = [2, 8, 8], strides = [1, 1, 1]} : vector<8x8x8xf32> to vector<2x8x8xf32>
    %71 = vector.shape_cast %70 : vector<2x8x8xf32> to vector<16x8xf32>
    %c0_58 = arith.constant 0 : index
    %c0_59 = arith.constant 0 : index
    %c0_60 = arith.constant 0 : index
    %72 = vector.load %arg6[%c0_58, %c0_59, %c0_60] : memref<4x8x32xf32, #tpu.memory_space<vmem>>, vector<1x8x32xf32>
    %73 = vector.shape_cast %72 : vector<1x8x32xf32> to vector<8x32xf32>
    %cst_61 = arith.constant dense<0.000000e+00> : vector<16x32xf32>
    %74 = tpu.matmul %71, %73, %cst_61 {dimension_numbers = #tpu.dot_dimension_numbers<[1], [0], [0], [1], [0, 0, 1, 1], [], []>} : vector<16x8xf32>, vector<8x32xf32>, vector<16x32xf32> -> vector<16x32xf32>
    %75 = arith.addf %0, %74 : vector<16x32xf32>
    %76 = vector.extract_strided_slice %69 {offsets = [2, 0, 0], sizes = [2, 8, 8], strides = [1, 1, 1]} : vector<8x8x8xf32> to vector<2x8x8xf32>
    %77 = vector.shape_cast %76 : vector<2x8x8xf32> to vector<16x8xf32>
    %c1_62 = arith.constant 1 : index
    %c0_63 = arith.constant 0 : index
    %c0_64 = arith.constant 0 : index
    %78 = vector.load %arg6[%c1_62, %c0_63, %c0_64] : memref<4x8x32xf32, #tpu.memory_space<vmem>>, vector<1x8x32xf32>
    %79 = vector.shape_cast %78 : vector<1x8x32xf32> to vector<8x32xf32>
    %cst_65 = arith.constant dense<0.000000e+00> : vector<16x32xf32>
    %80 = tpu.matmul %77, %79, %cst_65 {dimension_numbers = #tpu.dot_dimension_numbers<[1], [0], [0], [1], [0, 0, 1, 1], [], []>} : vector<16x8xf32>, vector<8x32xf32>, vector<16x32xf32> -> vector<16x32xf32>
    %81 = arith.addf %75, %80 : vector<16x32xf32>
    %82 = vector.extract_strided_slice %69 {offsets = [4, 0, 0], sizes = [2, 8, 8], strides = [1, 1, 1]} : vector<8x8x8xf32> to vector<2x8x8xf32>
    %83 = vector.shape_cast %82 : vector<2x8x8xf32> to vector<16x8xf32>
    %c2_66 = arith.constant 2 : index
    %c0_67 = arith.constant 0 : index
    %c0_68 = arith.constant 0 : index
    %84 = vector.load %arg6[%c2_66, %c0_67, %c0_68] : memref<4x8x32xf32, #tpu.memory_space<vmem>>, vector<1x8x32xf32>
    %85 = vector.shape_cast %84 : vector<1x8x32xf32> to vector<8x32xf32>
    %cst_69 = arith.constant dense<0.000000e+00> : vector<16x32xf32>
    %86 = tpu.matmul %83, %85, %cst_69 {dimension_numbers = #tpu.dot_dimension_numbers<[1], [0], [0], [1], [0, 0, 1, 1], [], []>} : vector<16x8xf32>, vector<8x32xf32>, vector<16x32xf32> -> vector<16x32xf32>
    %87 = arith.addf %81, %86 : vector<16x32xf32>
    %88 = vector.extract_strided_slice %69 {offsets = [6, 0, 0], sizes = [2, 8, 8], strides = [1, 1, 1]} : vector<8x8x8xf32> to vector<2x8x8xf32>
    %89 = vector.shape_cast %88 : vector<2x8x8xf32> to vector<16x8xf32>
    %c3_70 = arith.constant 3 : index
    %c0_71 = arith.constant 0 : index
    %c0_72 = arith.constant 0 : index
    %90 = vector.load %arg6[%c3_70, %c0_71, %c0_72] : memref<4x8x32xf32, #tpu.memory_space<vmem>>, vector<1x8x32xf32>
    %91 = vector.shape_cast %90 : vector<1x8x32xf32> to vector<8x32xf32>
    %cst_73 = arith.constant dense<0.000000e+00> : vector<16x32xf32>
    %92 = tpu.matmul %89, %91, %cst_73 {dimension_numbers = #tpu.dot_dimension_numbers<[1], [0], [0], [1], [0, 0, 1, 1], [], []>} : vector<16x8xf32>, vector<8x32xf32>, vector<16x32xf32> -> vector<16x32xf32>
    %93 = arith.addf %87, %92 : vector<16x32xf32>
    %cst_74 = arith.constant dense<0.000000e+00> : vector<16xf32>
    %94 = vector.multi_reduction <add>, %93, %cst_74 [1] : vector<16x32xf32> to vector<16xf32>
    %95 = vector.shape_cast %94 : vector<16xf32> to vector<16x1xf32>
    %cst_75 = arith.constant 3.200000e+01 : f32
    %96 = vector.broadcast %cst_75 : f32 to vector<16x1xf32>
    %97 = arith.divf %95, %96 : vector<16x1xf32>
    %98 = vector.broadcast %97 : vector<16x1xf32> to vector<16x32xf32>
    %99 = arith.subf %93, %98 : vector<16x32xf32>
    %100 = arith.mulf %99, %99 : vector<16x32xf32>
    %cst_76 = arith.constant dense<0.000000e+00> : vector<16xf32>
    %101 = vector.multi_reduction <add>, %100, %cst_76 [1] : vector<16x32xf32> to vector<16xf32>
    %102 = vector.shape_cast %101 : vector<16xf32> to vector<16x1xf32>
    %cst_77 = arith.constant 3.200000e+01 : f32
    %103 = vector.broadcast %cst_77 : f32 to vector<16x1xf32>
    %104 = arith.divf %102, %103 : vector<16x1xf32>
    %105 = vector.broadcast %97 : vector<16x1xf32> to vector<16x32xf32>
    %106 = arith.subf %93, %105 : vector<16x32xf32>
    %cst_78 = arith.constant 9.99999974E-6 : f32
    %107 = vector.broadcast %cst_78 : f32 to vector<16x1xf32>
    %108 = arith.addf %104, %107 : vector<16x1xf32>
    %109 = math.rsqrt %108 : vector<16x1xf32>
    %110 = vector.broadcast %109 : vector<16x1xf32> to vector<16x32xf32>
    %111 = arith.mulf %106, %110 : vector<16x32xf32>
    %c0_79 = arith.constant 0 : index
    %c0_80 = arith.constant 0 : index
    %112 = vector.load %arg8[%c0_79, %c0_80] : memref<16x32xf32, #tpu.memory_space<vmem>>, vector<16x32xf32>
    tpu.vector_store %arg8[%c0_79, %c0_80], %111 {strides = array<i32>} : memref<16x32xf32, #tpu.memory_space<vmem>>, vector<16x32xf32>,
    %113 = vector.extract_strided_slice %68 {offsets = [0, 0, 0], sizes = [1, 8, 8], strides = [1, 1, 1]} : vector<8x8x8xf32> to vector<1x8x8xf32>
    %114 = vector.shape_cast %113 : vector<1x8x8xf32> to vector<8x8xf32>
    %c0_81 = arith.constant 0 : index
    %c0_82 = arith.constant 0 : index
    %115 = vector.load %arg9[%c0_81, %c0_82] : memref<8x64xf32, #tpu.memory_space<vmem>>, vector<8x8xf32>
    tpu.vector_store %arg9[%c0_81, %c0_82], %114 {strides = array<i32>} : memref<8x64xf32, #tpu.memory_space<vmem>>, vector<8x8xf32>,
    %116 = vector.extract_strided_slice %68 {offsets = [1, 0, 0], sizes = [1, 8, 8], strides = [1, 1, 1]} : vector<8x8x8xf32> to vector<1x8x8xf32>
    %117 = vector.shape_cast %116 : vector<1x8x8xf32> to vector<8x8xf32>
    %c0_83 = arith.constant 0 : index
    %c8 = arith.constant 8 : index
    %118 = vector.load %arg9[%c0_83, %c8] : memref<8x64xf32, #tpu.memory_space<vmem>>, vector<8x8xf32>
    tpu.vector_store %arg9[%c0_83, %c8], %117 {strides = array<i32>} : memref<8x64xf32, #tpu.memory_space<vmem>>, vector<8x8xf32>,
    %119 = vector.extract_strided_slice %68 {offsets = [2, 0, 0], sizes = [1, 8, 8], strides = [1, 1, 1]} : vector<8x8x8xf32> to vector<1x8x8xf32>
    %120 = vector.shape_cast %119 : vector<1x8x8xf32> to vector<8x8xf32>
    %c0_84 = arith.constant 0 : index
    %c16 = arith.constant 16 : index
    %121 = vector.load %arg9[%c0_84, %c16] : memref<8x64xf32, #tpu.memory_space<vmem>>, vector<8x8xf32>
    tpu.vector_store %arg9[%c0_84, %c16], %120 {strides = array<i32>} : memref<8x64xf32, #tpu.memory_space<vmem>>, vector<8x8xf32>,
    %122 = vector.extract_strided_slice %68 {offsets = [3, 0, 0], sizes = [1, 8, 8], strides = [1, 1, 1]} : vector<8x8x8xf32> to vector<1x8x8xf32>
    %123 = vector.shape_cast %122 : vector<1x8x8xf32> to vector<8x8xf32>
    %c0_85 = arith.constant 0 : index
    %c24 = arith.constant 24 : index
    %124 = vector.load %arg9[%c0_85, %c24] : memref<8x64xf32, #tpu.memory_space<vmem>>, vector<8x8xf32>
    tpu.vector_store %arg9[%c0_85, %c24], %123 {strides = array<i32>} : memref<8x64xf32, #tpu.memory_space<vmem>>, vector<8x8xf32>,
    %125 = vector.extract_strided_slice %68 {offsets = [4, 0, 0], sizes = [1, 8, 8], strides = [1, 1, 1]} : vector<8x8x8xf32> to vector<1x8x8xf32>
    %126 = vector.shape_cast %125 : vector<1x8x8xf32> to vector<8x8xf32>
    %c0_86 = arith.constant 0 : index
    %c32 = arith.constant 32 : index
    %127 = vector.load %arg9[%c0_86, %c32] : memref<8x64xf32, #tpu.memory_space<vmem>>, vector<8x8xf32>
    tpu.vector_store %arg9[%c0_86, %c32], %126 {strides = array<i32>} : memref<8x64xf32, #tpu.memory_space<vmem>>, vector<8x8xf32>,
    %128 = vector.extract_strided_slice %68 {offsets = [5, 0, 0], sizes = [1, 8, 8], strides = [1, 1, 1]} : vector<8x8x8xf32> to vector<1x8x8xf32>
    %129 = vector.shape_cast %128 : vector<1x8x8xf32> to vector<8x8xf32>
    %c0_87 = arith.constant 0 : index
    %c40 = arith.constant 40 : index
    %130 = vector.load %arg9[%c0_87, %c40] : memref<8x64xf32, #tpu.memory_space<vmem>>, vector<8x8xf32>
    tpu.vector_store %arg9[%c0_87, %c40], %129 {strides = array<i32>} : memref<8x64xf32, #tpu.memory_space<vmem>>, vector<8x8xf32>,
    %131 = vector.extract_strided_slice %68 {offsets = [6, 0, 0], sizes = [1, 8, 8], strides = [1, 1, 1]} : vector<8x8x8xf32> to vector<1x8x8xf32>
    %132 = vector.shape_cast %131 : vector<1x8x8xf32> to vector<8x8xf32>
    %c0_88 = arith.constant 0 : index
    %c48 = arith.constant 48 : index
    %133 = vector.load %arg9[%c0_88, %c48] : memref<8x64xf32, #tpu.memory_space<vmem>>, vector<8x8xf32>
    tpu.vector_store %arg9[%c0_88, %c48], %132 {strides = array<i32>} : memref<8x64xf32, #tpu.memory_space<vmem>>, vector<8x8xf32>,
    %134 = vector.extract_strided_slice %68 {offsets = [7, 0, 0], sizes = [1, 8, 8], strides = [1, 1, 1]} : vector<8x8x8xf32> to vector<1x8x8xf32>
    %135 = vector.shape_cast %134 : vector<1x8x8xf32> to vector<8x8xf32>
    %c0_89 = arith.constant 0 : index
    %c56 = arith.constant 56 : index
    %136 = vector.load %arg9[%c0_89, %c56] : memref<8x64xf32, #tpu.memory_space<vmem>>, vector<8x8xf32>
    tpu.vector_store %arg9[%c0_89, %c56], %135 {strides = array<i32>} : memref<8x64xf32, #tpu.memory_space<vmem>>, vector<8x8xf32>,
    return
  }
}

</mosaic_0001>

<bundles_post_ra>
// kernel: multi_head_attention.1
= control target key start
LH: loop header
LB: loop body
LE: loop exit
PB: predicated region body
PF: predicated region fallthrough
CT: control target
= control target key end

     0   :  { %vm42_vm0 = vcmask 261120   ;;  %s1901_s0 = inlined_call_operand.vmem [shape: f32[16,32], index: 0, kind: input, shape index: {}]   ;;  %s1902_s1 = inlined_call_operand.vmem [shape: f32[16,32], index: 1, kind: input, shape index: {}]   ;;  %s1903_s2 = inlined_call_operand.vmem [shape: f32[16,32], index: 2, kind: input, shape index: {}]   ;;  %s1904_s3 = inlined_call_operand.vmem [shape: f32[4,32,8], index: 3, kind: input, shape index: {}]   ;;  %s1905_s4 = inlined_call_operand.vmem [shape: f32[4,32,8], index: 4, kind: input, shape index: {}]   ;;  %s1906_s5 = inlined_call_operand.vmem [shape: f32[4,32,8], index: 5, kind: input, shape index: {}]   ;;  %s1907_s6 = inlined_call_operand.vmem [shape: f32[4,8,32], index: 6, kind: input, shape index: {}]   ;;  %s1908_s7 = inlined_call_operand.vmem [shape: f32[8,8,8], index: 7, kind: input, shape index: {}]   ;;  %s1909_s8 = inlined_call_operand.hbm [shape: f32[16,32], index: 8, kind: output, shape index: {0}]   ;;  %s1910_s9 = inlined_call_operand.vmem [shape: f32[8,64], index: 9, kind: output, shape index: {1}]  }
   0x1   :  { %v41_v0 = vld [vmem:[%s1904_s3 + $0x18] sm:$0xff]  ;;  %v40_v4 = vld [vmem:[%s1904_s3 + $0x10] sm:$0xff]  ;;  %v39_v8 = vld [vmem:[%s1904_s3 + $0x8] sm:$0xff] }
   0x2   :  { %v75_v1 = vld [vmem:[%s1905_s4 + $0x18] sm:$0xff]  ;;  %61 = vmatpush.msra.mxu0 %v41_v0  ;;  %v74_v5 = vld [vmem:[%s1905_s4 + $0x10] sm:$0xff]  ;;  %v73_v9 = vld [vmem:[%s1905_s4 + $0x8] sm:$0xff] }
   0x3   :  { %v108_v2 = vld [vmem:[%s1906_s5 + $0x18] sm:$0xff]  ;;  %94 = vmatpush.msra.mxu1 %v75_v1  ;;  %v107_v6 = vld [vmem:[%s1906_s5 + $0x10] sm:$0xff]  ;;  %v106_v10 = vld [vmem:[%s1906_s5 + $0x8] sm:$0xff] }
   0x4   :  { %v1250_v3 = vld [vmem:[%s1904_s3 + $0x38] sm:$0xff]  ;;  %127 = vmatpush.msra.mxu2 %v108_v2  ;;  %v1249_v7 = vld [vmem:[%s1904_s3 + $0x30] sm:$0xff]  ;;  %62 = vmatpush.msra.mxu0 %v40_v4  ;;  %v1248_v11 = vld [vmem:[%s1904_s3 + $0x28] sm:$0xff] }
   0x5   :  { %155 = vmatpush.msra.mxu3 %v1250_v3  ;;  %95 = vmatpush.msra.mxu1 %v74_v5  ;;  %v38_v12 = vld [vmem:[%s1904_s3] sm:$0xff]  ;;  %v1268_v19 = vld [vmem:[%s1904_s3 + $0x58] sm:$0xff]  ;;  %v1255_v22 = vld [vmem:[%s1905_s4 + $0x30] sm:$0xff] }
   0x6   :  { %128 = vmatpush.msra.mxu2 %v107_v6  ;;  %v72_v13 = vld [vmem:[%s1905_s4] sm:$0xff]  ;;  %63 = vmatpush.msra.mxu0 %v39_v8  ;;  %v1256_v20 = vld [vmem:[%s1905_s4 + $0x38] sm:$0xff]  ;;  %v1267_v23 = vld [vmem:[%s1904_s3 + $0x50] sm:$0xff] }
   0x7   :  { %156 = vmatpush.msra.mxu3 %v1249_v7  ;;  %96 = vmatpush.msra.mxu1 %v73_v9  ;;  %v105_v14 = vld [vmem:[%s1906_s5] sm:$0xff]  ;;  %v1274_v21 = vld [vmem:[%s1905_s4 + $0x58] sm:$0xff]  ;;  %v1273_v24 = vld [vmem:[%s1905_s4 + $0x50] sm:$0xff] }
   0x8   :  { %v1247_v15 = vld [vmem:[%s1904_s3 + $0x20] sm:$0xff]  ;;  %129 = vmatpush.msra.mxu2 %v106_v10  ;;  %64 = vmatpush.msra.mxu0 %v38_v12  ;;  %v1262_v25 = vld [vmem:[%s1906_s5 + $0x38] sm:$0xff]  ;;  %v1261_v26 = vld [vmem:[%s1906_s5 + $0x30] sm:$0xff] }
   0x9   :  { %157 = vmatpush.msra.mxu3 %v1248_v11  ;;  %v1521_v16 = vld [vmem:[%s1901_s0] sm:$0xff]  ;;  %97 = vmatpush.msra.mxu1 %v72_v13  ;;  %v1254_v27 = vld [vmem:[%s1905_s4 + $0x28] sm:$0xff] }
   0xa   :  { %v1526_v17 = vld [vmem:[%s1902_s1] sm:$0xff]  ;;  %130 = vmatpush.msra.mxu2 %v105_v14  ;;  %1241 = vmatmul.msk.f32.vlgmr.msra.gmra.mxu0 %vm42_vm0, %v1521_v16  ;;  %v1266_v28 = vld [vmem:[%s1904_s3 + $0x48] sm:$0xff] }
   0xb   :  { %v1531_v18 = vld [vmem:[%s1903_s2] sm:$0xff]  ;;  %158 = vmatpush.msra.mxu3 %v1247_v15  ;;  %1243 = vmatmul.msk.f32.vlgmr.msra.gmra.mxu1 %vm42_vm0, %v1526_v17  ;;  %v1272_v29 = vld [vmem:[%s1905_s4 + $0x48] sm:$0xff] }
   0xc   :  { %1245 = vmatmul.msk.f32.vlgmr.msra.gmra.mxu2 %vm42_vm0, %v1531_v18  ;;  %1251 = vmatmul.msk.f32.vlgmr.msra.gmra.mxu3 %vm42_vm0, %v1521_v16  ;;  %v1260_v30 = vld [vmem:[%s1906_s5 + $0x28] sm:$0xff] }
   0xd   :  { %239 = vmatpush.msrb.mxu2 %v1268_v19  ;;  %183 = vmatpush.msrb.mxu0 %v1256_v20  ;;  %v1580_v31 = vld [vmem:[%s1901_s0 + $0x8] sm:$0xff] }
   0xe   :  { %267 = vmatpush.msrb.mxu3 %v1274_v21  ;;  %211 = vmatpush.msrb.mxu1 %v1262_v25  ;;  %v35_v32 = vld [vmem:[%s1902_s1 + $0x8] sm:$0xff] }
   0xf   :  { %184 = vmatpush.msrb.mxu0 %v1255_v22  ;;  %240 = vmatpush.msrb.mxu2 %v1267_v23  ;;  %v1588_v33 = vld [vmem:[%s1903_s2 + $0x8] sm:$0xff] }
  0x10   :  { %268 = vmatpush.msrb.mxu3 %v1273_v24  ;;  %212 = vmatpush.msrb.mxu1 %v1261_v26 }
  0x11   :  { %185 = vmatpush.msrb.mxu0 %v1254_v27  ;;  %241 = vmatpush.msrb.mxu2 %v1266_v28 }
  0x12   :  { %15 = vsyncpa [#allocation3], 0  ;;  %269 = vmatpush.msrb.mxu3 %v1272_v29  ;;  %v1253_v34 = vld [vmem:[%s1905_s4 + $0x20] sm:$0xff]  ;;  %213 = vmatpush.msrb.mxu1 %v1260_v30  ;;  %v1292_v37 = vld [vmem:[%s1905_s4 + $0x78] sm:$0xff]  ;;  %vm390_vm1 = vcmask 64512   ;;  %s1412_s24 = smov 8  }
  0x13   :  { %v1265_v35 = vld [vmem:[%s1904_s3 + $0x40] sm:$0xff]  ;;  %1242 = vmatmul.msk.f32.gmra.mxu0 %vm42_vm0, %v1580_v31  ;;  %1244 = vmatmul.msk.f32.gmra.mxu1 %vm42_vm0, %v35_v32  ;;  %v1280_v39 = vld [vmem:[%s1906_s5 + $0x58] sm:$0xff]  ;;  %v1291_v40 = vld [vmem:[%s1905_s4 + $0x70] sm:$0xff]  ;;  %s1414_s25 = smov 48   ;;  %s1416_s13 = smov 40  }
  0x14   :  { %v1271_v36 = vld [vmem:[%s1905_s4 + $0x40] sm:$0xff]  ;;  %1246 = vmatmul.msk.f32.gmra.mxu2 %vm42_vm0, %v1588_v33  ;;  %1252 = vmatmul.msk.f32.gmra.mxu3 %vm42_vm0, %v1580_v31  ;;  %v1286_v41 = vld [vmem:[%s1904_s3 + $0x78] sm:$0xff]  ;;  %v1279_v42 = vld [vmem:[%s1906_s5 + $0x50] sm:$0xff]  ;;  %s1417_s14 = smov 56   ;;  %s1419_s20 = smov 128  }
  0x15   :  { %v1259_v38 = vld [vmem:[%s1906_s5 + $0x20] sm:$0xff]  ;;  %186 = vmatpush.msrb.mxu0 %v1253_v34  ;;  %242 = vmatpush.msrb.mxu2 %v1265_v35  ;;  %v1290_v43 = vld [vmem:[%s1905_s4 + $0x68] sm:$0xff]  ;;  %v1285_v44 = vld [vmem:[%s1904_s3 + $0x70] sm:$0xff] }
  0x16   :  { %270 = vmatpush.msrb.mxu3 %v1271_v36  ;;  %214 = vmatpush.msrb.mxu1 %v1259_v38  ;;  %v1289_v45 = vld [vmem:[%s1905_s4 + $0x60] sm:$0xff]  ;;  %v1284_v46 = vld [vmem:[%s1904_s3 + $0x68] sm:$0xff]  ;;  %v1298_v50 = vld [vmem:[%s1906_s5 + $0x78] sm:$0xff] }
  0x17   :  { %351 = vmatpush.msra.mxu2 %v1292_v37  ;;  %295 = vmatpush.msra.mxu0 %v1280_v39  ;;  %v1278_v47 = vld [vmem:[%s1906_s5 + $0x48] sm:$0xff]  ;;  %v1283_v48 = vld [vmem:[%s1904_s3 + $0x60] sm:$0xff]  ;;  %v1297_v51 = vld [vmem:[%s1906_s5 + $0x70] sm:$0xff]  ;;  %s1225_s3 = sshll.u32 %s1909_s8, 4  ;;  %s1226_s3 = int_to_ptr.hbm [resolvable:$true] %s1225_s3 }
  0x18   :  { %323 = vmatpush.msra.mxu1 %v1286_v41  ;;  %v1277_v49 = vld [vmem:[%s1906_s5 + $0x40] sm:$0xff]  ;;  %379 = vmatpush.msra.mxu3 %v1298_v50  ;;  %v1296_v52 = vld [vmem:[%s1906_s5 + $0x68] sm:$0xff]  ;;  %v601_v20 = vld [vmem:[%s1908_s7 + $0x10] sm:$0xff] }
  0x19   :  { %352 = vmatpush.msra.mxu2 %v1291_v40  ;;  %296 = vmatpush.msra.mxu0 %v1279_v42  ;;  %v1295_v53 = vld [vmem:[%s1906_s5 + $0x60] sm:$0xff]  ;;  %v600_v14 = vld [vmem:[%s1908_s7 + $0x8] sm:$0xff]  ;;  %vm609_vm3 = vcmp.ne.f32.partialorder %v601_v20, 0.0  ;;  %v602_v29 = vld [vmem:[%s1908_s7 + $0x18] sm:$0xff]  ;;  %s1413_s5 = smov 32  }
  0x1a   :  { %324 = vmatpush.msra.mxu1 %v1285_v44  ;;  %380 = vmatpush.msra.mxu3 %v1297_v51  ;;  %vm608_vm2 = vcmp.ne.f32.partialorder %v600_v14, 0.0  ;;  %v603_v21 = vld [vmem:[%s1908_s7 + $0x20] sm:$0xff]  ;;  %vm610_vm6 = vcmp.ne.f32.partialorder %v602_v29, 0.0  ;;  %v605_v36 = vld [vmem:[%s1908_s7 + $0x30] sm:$0xff]  ;;  %v604_v38 = vld [vmem:[%s1908_s7 + $0x28] sm:$0xff] }
  0x1b   :  { %353 = vmatpush.msra.mxu2 %v1290_v43  ;;  %1257 = vmatmul.msk.f32.vlgmr.msrb.gmra.mxu0 %vm42_vm0, %v1526_v17  ;;  %vm611_vm4 = vcmp.ne.f32.partialorder %v603_v21, 0.0  ;;  %v599_v23 = vld [vmem:[%s1908_s7] sm:$0xff]  ;;  %vm613_vm7 = vcmp.ne.f32.partialorder %v605_v36, 0.0  ;;  %v606_v41 = vld [vmem:[%s1908_s7 + $0x38] sm:$0xff]  ;;  %vm612_vm8 = vcmp.ne.f32.partialorder %v604_v38, 0.0  ;;  %s1410_s7 = smov 16  }
  0x1c   :  { %1263 = vmatmul.msk.f32.vlgmr.msrb.gmra.mxu1 %vm42_vm0, %v1531_v18  ;;  %1269 = vmatmul.msk.f32.vlgmr.msrb.gmra.mxu2 %vm42_vm0, %v1521_v16  ;;  %vm607_vm5 = vcmp.ne.f32.partialorder %v599_v23, 0.0  ;;  %vm614_vm9 = vcmp.ne.f32.partialorder %v606_v41, 0.0 }
  0x1d   :  { %1275 = vmatmul.msk.f32.vlgmr.msrb.gmra.mxu3 %vm42_vm0, %v1526_v17  ;;  %354 = vmatpush.msra.mxu2 %v1289_v45 }
  0x1e   :  { %325 = vmatpush.msra.mxu1 %v1284_v46  ;;  %297 = vmatpush.msra.mxu0 %v1278_v47 }
  0x1f   :  { %381 = vmatpush.msra.mxu3 %v1296_v52 }
  0x20   :  { %326 = vmatpush.msra.mxu1 %v1283_v48  ;;  %298 = vmatpush.msra.mxu0 %v1277_v49 }
  0x21   :  { %382 = vmatpush.msra.mxu3 %v1295_v53 }
  0x23   :  { %1258 = vmatmul.msk.f32.gmra.mxu0 %vm42_vm0, %v35_v32 }
  0x24   :  { %1264 = vmatmul.msk.f32.gmra.mxu1 %vm42_vm0, %v1588_v33  ;;  %1270 = vmatmul.msk.f32.gmra.mxu2 %vm42_vm0, %v1580_v31 }
  0x25   :  { %1276 = vmatmul.msk.f32.gmra.mxu3 %vm42_vm0, %v35_v32 }
  0x2b   :  { %1281 = vmatmul.msk.f32.vlgmr.msra.gmra.mxu0 %vm42_vm0, %v1531_v18 }
  0x2c   :  { %1287 = vmatmul.msk.f32.vlgmr.msra.gmra.mxu1 %vm42_vm0, %v1521_v16  ;;  %1293 = vmatmul.msk.f32.vlgmr.msra.gmra.mxu2 %vm42_vm0, %v1526_v17 }
  0x2d   :  { %1299 = vmatmul.msk.f32.vlgmr.msra.gmra.mxu3 %vm42_vm0, %v1531_v18 }
  0x33   :  { %1282 = vmatmul.msk.f32.gmra.mxu0 %vm42_vm0, %v1588_v33 }
  0x34   :  { %1288 = vmatmul.msk.f32.gmra.mxu1 %vm42_vm0, %v1580_v31  ;;  %1294 = vmatmul.msk.f32.gmra.mxu2 %vm42_vm0, %v35_v32 }
  0x35   :  { %1300 = vmatmul.msk.f32.gmra.mxu3 %vm42_vm0, %v1588_v33 }
  0x87   :  { %v66_v54 = vpop.f32.mrf.mxu0 }
  0x88   :  { %v99_v55 = vpop.f32.mrf.mxu1 }
  0x89   :  { %1301 = vmatpush.xpose.msk.msrb.mxu0 %vm390_vm1, %v99_v55 }
  0x8c   :  { %1302 = vmatmul.msk.f32.vlgmr.msrb.gmra.mxu0 %vm390_vm1, %v66_v54 }
  0x8f   :  { %v132_v56 = vpop.f32.mrf.mxu2  ;;  %v160_v57 = vpop.f32.mrf.mxu3 }
  0x90   :  { %v69_v58 = vpop.f32.mrf.mxu0  ;;  %v102_v59 = vpop.f32.mrf.mxu1 }
  0x91   :  { %1303 = vmatpush.xpose.msk.msrb.mxu1 %vm390_vm1, %v102_v59 }
  0x94   :  { %1304 = vmatmul.msk.f32.vlgmr.msrb.gmra.mxu1 %vm390_vm1, %v69_v58 }
  0x97   :  { %v135_v60 = vpop.f32.mrf.mxu2  ;;  %v163_v61 = vpop.f32.mrf.mxu3 }
  0x98   :  { %v188_v62 = vpop.f32.mrf.mxu0 }
  0x99   :  { %1305 = vmatpush.xpose.msk.msrb.mxu2 %vm390_vm1, %v188_v62  ;;  %v216_v63 = vpop.f32.mrf.mxu1 }
  0x9c   :  { %1306 = vmatmul.msk.f32.vlgmr.msrb.gmra.mxu2 %vm390_vm1, %v160_v57 }
  0x9f   :  { %v244_v0 = vpop.f32.mrf.mxu2 }
  0xa0   :  { %v272_v1 = vpop.f32.mrf.mxu3  ;;  %v191_v2 = vpop.f32.mrf.mxu0 }
  0xa1   :  { %1309 = vmatpush.xpose.msk.msra.mxu0 %vm390_vm1, %v272_v1  ;;  %1307 = vmatpush.xpose.msk.msrb.mxu3 %vm390_vm1, %v191_v2  ;;  %v219_v3 = vpop.f32.mrf.mxu1 }
  0xa4   :  { %1310 = vmatmul.msk.f32.vlgmr.msra.gmra.mxu0 %vm390_vm1, %v244_v0  ;;  %1308 = vmatmul.msk.f32.vlgmr.msrb.gmra.mxu3 %vm390_vm1, %v163_v61 }
  0xa5   :  { %833 = vmatpush.msrb.mxu0 %v132_v56 }
  0xa7   :  { %v247_v4 = vpop.f32.mrf.mxu2 }
  0xa8   :  { %v275_v5 = vpop.f32.mrf.mxu3  ;;  %v300_v6 = vpop.f32.mrf.mxu0 }
  0xa9   :  { %1311 = vmatpush.xpose.msk.msra.mxu1 %vm390_vm1, %v275_v5  ;;  %925 = vmatpush.msra.mxu0 %v300_v6  ;;  %v328_v7 = vpop.f32.mrf.mxu1 }
  0xac   :  { %1312 = vmatmul.msk.f32.vlgmr.msra.gmra.mxu1 %vm390_vm1, %v247_v4 }
  0xad   :  { %856 = vmatpush.msrb.mxu1 %v135_v60 }
  0xaf   :  { %v356_v8 = vpop.f32.mrf.mxu2 }
  0xb0   :  { %1313 = vmatpush.xpose.msk.msra.mxu2 %vm390_vm1, %v356_v8  ;;  %v303_v9 = vpop.f32.mrf.mxu0  ;;  %v384_v12 = vpop.f32.mrf.mxu3 }
  0xb1   :  { %948 = vmatpush.msra.mxu1 %v303_v9  ;;  %v331_v11 = vpop.f32.mrf.mxu1 }
  0xb3   :  { %1314 = vmatmul.msk.f32.vlgmr.msra.gmra.mxu2 %vm390_vm1, %v328_v7 }
  0xb4   :  { %879 = vmatpush.msrb.mxu2 %v216_v63 }
  0xb6   :  { %971 = vmatpush.msra.mxu2 %v384_v12 }
  0xb7   :  { %v359_v10 = vpop.f32.mrf.mxu2 }
  0xb8   :  { %1315 = vmatpush.xpose.msk.msra.mxu3 %vm390_vm1, %v359_v10  ;;  %v387_v13 = vpop.f32.mrf.mxu3 }
  0xbb   :  { %1316 = vmatmul.msk.f32.vlgmr.msra.gmra.mxu3 %vm390_vm1, %v331_v11 }
  0xbc   :  { %902 = vmatpush.msrb.mxu3 %v219_v3 }
  0xbe   :  { %994 = vmatpush.msra.mxu3 %v387_v13 }
 0x109   :  { %v414_v19 = vpop.f32.mrf.mxu0 }
 0x10a   :  { %v615_v30 = vsel %vm607_vm5, -1e+09, %v414_v19 }
 0x10b   :  { %v623_v35 = vsel %vm390_vm1, %v615_v30, -inf }
 0x111   :  { %v440_v15 = vpop.f32.mrf.mxu1 }
 0x112   :  { %v1705_v17 = vsel %vm608_vm2, -1e+09, %v440_v15 }
 0x113   :  { %v626_v18 = vsel %vm390_vm1, %v1705_v17, -inf }
 0x114   :  { %627 = vmax.xlane.f32.xlu2 %v626_v18 }
 0x11f   :  { %v466_v22 = vpop.f32.mrf.mxu2 }
 0x120   :  { %v617_v24 = vsel %vm609_vm3, -1e+09, %v466_v22 }
 0x121   :  { %v518_v25 = vpop.f32.mrf.mxu0  ;;  %v629_v27 = vsel %vm390_vm1, %v617_v24, -inf }
 0x122   :  { %v619_v26 = vsel %vm611_vm4, -1e+09, %v518_v25  ;;  %630 = vmax.xlane.f32.xlu0 %v629_v27 }
 0x123   :  { %v635_v28 = vsel %vm390_vm1, %v619_v26, -inf }
 0x124   :  { %636 = vmax.xlane.f32.xlu2 %v635_v28 }
 0x127   :  { %v492_v32 = vpop.f32.mrf.mxu3 }
 0x128   :  { %v618_v33 = vsel %vm610_vm6, -1e+09, %v492_v32 }
 0x129   :  { %v632_v34 = vsel %vm390_vm1, %v618_v33, -inf  ;;  %v544_v42 = vpop.f32.mrf.mxu1 }
 0x12a   :  { %633 = vmax.xlane.f32.xlu1 %v632_v34  ;;  %624 = vmax.xlane.f32.xlu0 %v623_v35  ;;  %v620_v43 = vsel %vm612_vm8, -1e+09, %v544_v42 }
 0x12b   :  { %v638_v46 = vsel %vm390_vm1, %v620_v43, -inf }
 0x136   :  { %v570_v37 = vpop.f32.mrf.mxu2 }
 0x137   :  { %v621_v39 = vsel %vm613_vm7, -1e+09, %v570_v37 }
 0x138   :  { %v641_v40 = vsel %vm390_vm1, %v621_v39, -inf }
 0x139   :  { %642 = vmax.xlane.f32.xlu1 %v641_v40 }
 0x13e   :  { %v596_v44 = vpop.f32.mrf.mxu3 }
 0x13f   :  { %v622_v45 = vsel %vm614_vm9, -1e+09, %v596_v44 }
 0x140   :  { %v644_v47 = vsel %vm390_vm1, %v622_v45, -inf }
 0x141   :  { %639 = vmax.xlane.f32.xlu1 %v638_v46  ;;  %645 = vmax.xlane.f32.xlu0 %v644_v47 }
 0x187   :  { %v628_v48 = vpop.xlane.xlu2 %627 }
 0x188   :  { %v648_v61 = vsub.f32 %v1705_v17, %v628_v48 }
 0x18a   :  { %v657_v0 = vmul.f32 1.442695, %v648_v61 }
 0x195   :  { %v631_v49 = vpop.xlane.xlu0 %630 }
 0x196   :  { %v649_v50 = vsub.f32 %v617_v24, %v631_v49 }
 0x197   :  { %v637_v52 = vpop.xlane.xlu2 %636 }
 0x198   :  { %v659_v51 = vmul.f32 1.442695, %v649_v50  ;;  %v651_v58 = vsub.f32 %v619_v26, %v637_v52 }
 0x19a   :  { %1346 = vpow2.f32 %v659_v51  ;;  %v663_v63 = vmul.f32 1.442695, %v651_v58 }
 0x19d   :  { %v634_v53 = vpop.xlane.xlu1 %633  ;;  %v625_v54 = vpop.xlane.xlu0 %624 }
 0x19e   :  { %v650_v55 = vsub.f32 %v618_v33, %v634_v53  ;;  %v647_v56 = vsub.f32 %v615_v30, %v625_v54 }
 0x1a0   :  { %v1737_v57 = vpop.eup %1346  ;;  %v661_v59 = vmul.f32 1.442695, %v650_v55  ;;  %v655_v60 = vmul.f32 1.442695, %v647_v56 }
 0x1a1   :  { %v677_v62 = vsel %vm390_vm1, %v1737_v57, 0.0 }
 0x1a2   :  { %1348 = vpow2.f32 %v661_v59  ;;  %678 = vadd.xlane.f32.xlu2 %v677_v62 }
 0x1a3   :  { %1350 = vpow2.f32 %v655_v60 }
 0x1a4   :  { %1352 = vpow2.f32 %v663_v63 }
 0x1a5   :  { %1354 = vpow2.f32 %v657_v0 }
 0x1a8   :  { %v1742_v1 = vpop.eup %1348 }
 0x1a9   :  { %v1744_v2 = vpop.eup %1350  ;;  %v680_v3 = vsel %vm390_vm1, %v1742_v1, 0.0 }
 0x1aa   :  { %681 = vadd.xlane.f32.xlu1 %v680_v3  ;;  %v671_v4 = vsel %vm390_vm1, %v1744_v2, 0.0  ;;  %v1750_v7 = vpop.eup %1352 }
 0x1ab   :  { %672 = vadd.xlane.f32.xlu0 %v671_v4  ;;  %v1752_v8 = vpop.eup %1354  ;;  %v683_v10 = vsel %vm390_vm1, %v1750_v7, 0.0 }
 0x1ac   :  { %v643_v5 = vpop.xlane.xlu1 %642  ;;  %v674_v11 = vsel %vm390_vm1, %v1752_v8, 0.0 }
 0x1ad   :  { %v653_v6 = vsub.f32 %v621_v39, %v643_v5 }
 0x1af   :  { %v667_v9 = vmul.f32 1.442695, %v653_v6 }
 0x1b1   :  { %1356 = vpow2.f32 %v667_v9 }
 0x1b2   :  { %684 = vadd.xlane.f32.xlu1 %v683_v10 }
 0x1b3   :  { %675 = vadd.xlane.f32.xlu0 %v674_v11 }
 0x1b4   :  { %v640_v12 = vpop.xlane.xlu1 %639  ;;  %v646_v13 = vpop.xlane.xlu0 %645 }
 0x1b5   :  { %v652_v14 = vsub.f32 %v620_v43, %v640_v12  ;;  %v654_v15 = vsub.f32 %v622_v45, %v646_v13 }
 0x1b7   :  { %v1758_v17 = vpop.eup %1356  ;;  %v665_v18 = vmul.f32 1.442695, %v652_v14  ;;  %v669_v19 = vmul.f32 1.442695, %v654_v15 }
 0x1b8   :  { %v689_v20 = vsel %vm390_vm1, %v1758_v17, 0.0 }
 0x1b9   :  { %1358 = vpow2.f32 %v665_v18  ;;  %690 = vadd.xlane.f32.xlu2 %v689_v20 }
 0x1ba   :  { %1360 = vpow2.f32 %v669_v19 }
 0x1bf   :  { %v1762_v21 = vpop.eup %1358 }
 0x1c0   :  { %v1764_v22 = vpop.eup %1360  ;;  %v686_v23 = vsel %vm390_vm1, %v1762_v21, 0.0 }
 0x1c1   :  { %687 = vadd.xlane.f32.xlu0 %v686_v23  ;;  %v692_v24 = vsel %vm390_vm1, %v1764_v22, 0.0 }
 0x1c2   :  { %693 = vadd.xlane.f32.xlu2 %v692_v24 }
 0x215   :  { %v679_v25 = vpop.xlane.xlu2 %678 }
 0x216   :  { %1362 = vrcp.f32 %v679_v25  ;;  %v736_v33 = vand.u32 2147483648, %v679_v25  ;;  %vm730_vm11 = vweird.f32 %v679_v25  ;;  %v734_v36 = vand.u32 2147483647, %v679_v25 }
 0x218   :  { %v737_v44 = vor.u32 1.1754944e-38, %v736_v33  ;;  %vm735_vm13 = vcmp.eq.f32.partialorder %v734_v36, 8.507059e+37 }
 0x21c   :  { %v1363_v26 = vpop.eup %1362 }
 0x21d   :  { %v726_v27 = vmul.f32 %v1363_v26, %v679_v25  ;;  %v682_v28 = vpop.xlane.xlu1 %681  ;;  %vm731_vm10 = vweird.f32 %v1363_v26 }
 0x21e   :  { %1364 = vrcp.f32 %v682_v28  ;;  %v673_v29 = vpop.xlane.xlu0 %672  ;;  %vm1772_vm12 = vmor %vm730_vm11, %vm731_vm10  ;;  %v749_v46 = vand.u32 2147483647, %v682_v28  ;;  %v751_v47 = vand.u32 2147483648, %v682_v28  ;;  %vm745_vm2 = vweird.f32 %v682_v28 }
 0x21f   :  { %v727_v30 = vsub.f32 1.0, %v726_v27  ;;  %1366 = vrcp.f32 %v673_v29  ;;  %v706_v50 = vand.u32 2147483648, %v673_v29  ;;  %v704_v53 = vand.u32 2147483647, %v673_v29 }
 0x220   :  { %vm750_vm4 = vcmp.eq.f32.partialorder %v749_v46, 8.507059e+37  ;;  %v752_v59 = vor.u32 1.1754944e-38, %v751_v47  ;;  %vm700_vm5 = vweird.f32 %v673_v29 }
 0x221   :  { %v728_v32 = vmul.f32 %v1363_v26, %v727_v30  ;;  %v707_v0 = vor.u32 1.1754944e-38, %v706_v50  ;;  %vm705_vm7 = vcmp.eq.f32.partialorder %v704_v53, 8.507059e+37 }
 0x223   :  { %v729_v34 = vadd.f32 %v1363_v26, %v728_v32 }
 0x224   :  { %v1365_v35 = vpop.eup %1364 }
 0x225   :  { %v1367_v37 = vpop.eup %1366  ;;  %v741_v38 = vmul.f32 %v1365_v35, %v682_v28  ;;  %v1770_v39 = vpop.xlane.xlu1 %684  ;;  %v733_v43 = vsel %vm1772_vm12, %v1363_v26, %v729_v34  ;;  %vm746_vm14 = vweird.f32 %v1365_v35 }
 0x226   :  { %v696_v41 = vmul.f32 %v1367_v37, %v673_v29  ;;  %v1776_v42 = vpop.xlane.xlu0 %675  ;;  %1368 = vrcp.f32 %v1770_v39  ;;  %v738_v51 = vsel %vm735_vm13, %v737_v44, %v733_v43  ;;  %vm701_vm15 = vweird.f32 %v1367_v37  ;;  %vm1783_vm3 = vmor %vm745_vm2, %vm746_vm14 }
 0x227   :  { %v742_v45 = vsub.f32 1.0, %v741_v38  ;;  %1370 = vrcp.f32 %v1776_v42  ;;  %v739_v55 = vmul.f32 %v1737_v57, %v738_v51  ;;  %vm702_vm6 = vmor %vm700_vm5, %vm701_vm15  ;;  %v766_v11 = vand.u32 2147483648, %v1770_v39 }
 0x228   :  { %v697_v48 = vsub.f32 1.0, %v696_v41  ;;  %v721_v14 = vand.u32 2147483648, %v1776_v42  ;;  %v764_v18 = vand.u32 2147483647, %v1770_v39  ;;  %v719_v20 = vand.u32 2147483647, %v1776_v42 }
 0x229   :  { %v743_v49 = vmul.f32 %v1365_v35, %v742_v45  ;;  %1189 = vrot.lane.b32.xlu0 %v739_v55, %s1410_s7  ;;  %1319 = vmatmul.msk.f32.vlgmr.msrb.gmra.mxu2 %vm390_vm1, %v739_v55  ;;  %vm760_vm10 = vweird.f32 %v1770_v39  ;;  %vm715_vm11 = vweird.f32 %v1776_v42  ;;  %v767_v24 = vor.u32 1.1754944e-38, %v766_v11  ;;  %s1418_s7 = smov [#allocation2]  }
 0x22a   :  { %v698_v52 = vmul.f32 %v1367_v37, %v697_v48  ;;  %v722_v27 = vor.u32 1.1754944e-38, %v721_v14  ;;  %vm765_vm14 = vcmp.eq.f32.partialorder %v764_v18, 8.507059e+37  ;;  %vm720_vm15 = vcmp.eq.f32.partialorder %v719_v20, 8.507059e+37  ;;  %s1223_s1 = sshll.u32 %s1418_s7, 4  ;;  %s1224_s1 = int_to_ptr.vmem [resolvable:$true] %s1223_s1 }
 0x22b   :  { %v744_v54 = vadd.f32 %v1365_v35, %v743_v49 }
 0x22c   :  { %v1369_v56 = vpop.eup %1368  ;;  %v699_v60 = vadd.f32 %v1367_v37, %v698_v52  ;;  %v1787_v61 = vpop.xlane.xlu2 %690 }
 0x22d   :  { %v1371_v62 = vpop.eup %1370  ;;  %v748_v63 = vsel %vm1783_vm3, %v1365_v35, %v744_v54  ;;  %v756_v3 = vmul.f32 %v1369_v56, %v1770_v39  ;;  %1372 = vrcp.f32 %v1787_v61  ;;  %vm761_vm8 = vweird.f32 %v1369_v56 }
 0x22e   :  { %v753_v57 = vsel %vm750_vm4, %v752_v59, %v748_v63  ;;  %v703_v4 = vsel %vm702_vm6, %v1367_v37, %v699_v60  ;;  %v711_v5 = vmul.f32 %v1371_v62, %v1776_v42  ;;  %vm716_vm9 = vweird.f32 %v1371_v62  ;;  %vm762_vm12 = vmor %vm760_vm10, %vm761_vm8 }
 0x22f   :  { %v708_v6 = vsel %vm705_vm7, %v707_v0, %v703_v4  ;;  %v757_v9 = vsub.f32 1.0, %v756_v3  ;;  %v1798_v13 = vmul.f32 %v1742_v1, %v753_v57  ;;  %vm717_vm13 = vmor %vm715_vm11, %vm716_vm9  ;;  %v796_v35 = vand.u32 2147483648, %v1787_v61  ;;  %v1327_v3 = vld [vmem:[%s1907_s6 + $0x8] sm:$0xff]  ;;  %v1330_v57 = vld [vmem:[%s1907_s6 + $0x10] sm:$0xff] }
 0x230   :  { %v712_v10 = vsub.f32 1.0, %v711_v5  ;;  %v709_v12 = vmul.f32 %v1744_v2, %v708_v6  ;;  %v794_v37 = vand.u32 2147483647, %v1787_v61  ;;  %vm790_vm3 = vweird.f32 %v1787_v61  ;;  %1087 = vmatpush.msrb.mxu2 %v1330_v57 }
 0x231   :  { %v758_v15 = vmul.f32 %v1369_v56, %v757_v9  ;;  %1320 = vmatmul.msk.f32.vlgmr.msrb.gmra.mxu3 %vm390_vm1, %v1798_v13  ;;  %v797_v42 = vor.u32 1.1754944e-38, %v796_v35 }
 0x232   :  { %v713_v19 = vmul.f32 %v1371_v62, %v712_v10  ;;  %1317 = vmatmul.msk.f32.vlgmr.msrb.gmra.mxu0 %vm390_vm1, %v709_v12  ;;  %1183 = vst.msk [vmem:[%s1910_s9] sm:$0xff] %vm390_vm1, %v709_v12  ;;  %vm795_vm5 = vcmp.eq.f32.partialorder %v794_v37, 8.507059e+37 }
 0x233   :  { %v1373_v1 = vpop.eup %1372  ;;  %v759_v2 = vadd.f32 %v1369_v56, %v758_v15 }
 0x234   :  { %v714_v23 = vadd.f32 %v1371_v62, %v713_v19  ;;  %v786_v25 = vmul.f32 %v1373_v1, %v1787_v61  ;;  %v688_v26 = vpop.xlane.xlu0 %687  ;;  %vm791_vm2 = vweird.f32 %v1373_v1 }
 0x235   :  { %v763_v28 = vsel %vm762_vm12, %v1369_v56, %v759_v2  ;;  %1374 = vrcp.f32 %v688_v26  ;;  %v694_v29 = vpop.xlane.xlu2 %693  ;;  %vm792_vm4 = vmor %vm790_vm3, %vm791_vm2  ;;  %v781_v48 = vand.u32 2147483648, %v688_v26  ;;  %v779_v50 = vand.u32 2147483647, %v688_v26 }
 0x236   :  { %v718_v30 = vsel %vm717_vm13, %v1371_v62, %v714_v23  ;;  %v768_v32 = vsel %vm765_vm14, %v767_v24, %v763_v28  ;;  %v787_v33 = vsub.f32 1.0, %v786_v25  ;;  %1376 = vrcp.f32 %v694_v29 }
 0x237   :  { %v723_v34 = vsel %vm720_vm15, %v722_v27, %v718_v30  ;;  %v1819_v39 = vmul.f32 %v1750_v7, %v768_v32  ;;  %vm775_vm7 = vweird.f32 %v688_v26  ;;  %v811_v52 = vand.u32 2147483648, %v694_v29 }
 0x238   :  { %v788_v36 = vmul.f32 %v1373_v1, %v787_v33  ;;  %v1816_v38 = vmul.f32 %v1752_v8, %v723_v34  ;;  %v809_v55 = vand.u32 2147483647, %v694_v29  ;;  %v782_v56 = vor.u32 1.1754944e-38, %v781_v48 }
 0x239   :  { %vm780_vm10 = vcmp.eq.f32.partialorder %v779_v50, 8.507059e+37  ;;  %vm805_vm11 = vweird.f32 %v694_v29  ;;  %v812_v60 = vor.u32 1.1754944e-38, %v811_v52  ;;  %vm1187_vm14 = vcmask 130112  }
 0x23a   :  { %v789_v40 = vadd.f32 %v1373_v1, %v788_v36  ;;  %1318 = vmatmul.msk.f32.vlgmr.msrb.gmra.mxu1 %vm390_vm1, %v1816_v38  ;;  %1321 = vmatmul.msk.f32.vlgmr.msra.gmra.mxu0 %vm390_vm1, %v1819_v39  ;;  %vm810_vm13 = vcmp.eq.f32.partialorder %v809_v55, 8.507059e+37  ;;  %vm1192_vm15 = vcmask 195712   ;;  %vm1197_vm2 = vcmask 261312  }
 0x23b   :  { %v1375_v41 = vpop.eup %1374  ;;  %1054 = vmatpush.msrb.mxu1 %v1327_v3  ;;  %vm1202_vm3 = vcmask 326912  }
 0x23c   :  { %v793_v43 = vsel %vm792_vm4, %v1373_v1, %v789_v40  ;;  %v771_v44 = vmul.f32 %v1375_v41, %v688_v26  ;;  %v1377_v8 = vpop.eup %1376  ;;  %vm776_vm6 = vweird.f32 %v1375_v41  ;;  %vm1207_vm4 = vcmask 392512  }
 0x23d   :  { %v798_v45 = vsel %vm795_vm5, %v797_v42, %v793_v43  ;;  %v801_v7 = vmul.f32 %v1377_v8, %v694_v29  ;;  %vm806_vm8 = vweird.f32 %v1377_v8  ;;  %vm777_vm9 = vmor %vm775_vm7, %vm776_vm6  ;;  %vm1212_vm6 = vcmask 458112  }
 0x23e   :  { %v772_v46 = vsub.f32 1.0, %v771_v44  ;;  %v1827_v47 = vmul.f32 %v1758_v17, %v798_v45  ;;  %vm807_vm12 = vmor %vm805_vm11, %vm806_vm8 }
 0x23f   :  { %v802_v51 = vsub.f32 1.0, %v801_v7 }
 0x240   :  { %v773_v49 = vmul.f32 %v1375_v41, %v772_v46  ;;  %1323 = vmatmul.msk.f32.vlgmr.msra.gmra.mxu2 %vm390_vm1, %v1827_v47 }
 0x241   :  { %v803_v54 = vmul.f32 %v1377_v8, %v802_v51 }
 0x242   :  { %v774_v53 = vadd.f32 %v1375_v41, %v773_v49 }
 0x243   :  { %v804_v17 = vadd.f32 %v1377_v8, %v803_v54 }
 0x244   :  { %v778_v58 = vsel %vm777_vm9, %v1375_v41, %v774_v53 }
 0x245   :  { %v783_v59 = vsel %vm780_vm10, %v782_v56, %v778_v58  ;;  %v808_v61 = vsel %vm807_vm12, %v1377_v8, %v804_v17  ;;  %vm1217_vm12 = vcmask 523712  }
 0x246   :  { %v1832_v62 = vmul.f32 %v1762_v21, %v783_v59  ;;  %v813_v63 = vsel %vm810_vm13, %v812_v60, %v808_v61  ;;  %v999_v21 = vld [vmem:[%s1907_s6] sm:$0xff] }
 0x247   :  { %v1837_v0 = vmul.f32 %v1764_v22, %v813_v63  ;;  %1021 = vmatpush.msrb.mxu0 %v999_v21  ;;  %v1333_v22 = vld [vmem:[%s1907_s6 + $0x18] sm:$0xff]  ;;  %s1411_s6 = smov 24  }
 0x248   :  { %1322 = vmatmul.msk.f32.vlgmr.msra.gmra.mxu1 %vm390_vm1, %v1832_v62  ;;  %1120 = vmatpush.msrb.mxu3 %v1333_v22 }
 0x249   :  { %1324 = vmatmul.msk.f32.vlgmr.msra.gmra.mxu3 %vm390_vm1, %v1837_v0 }
 0x29b   :  { %v1190_v49 = vpop.permute.xlu0 %1189 }
 0x2ac   :  { %v881_v5 = vpop.f32.mrf.mxu2 }
 0x2ad   :  { %1328 = vmatmul.msk.f32.vlgmr.msrb.gmra.mxu1 %vm390_vm1, %v881_v5 }
 0x2af   :  { %v835_v4 = vpop.f32.mrf.mxu0 }
 0x2b0   :  { %1325 = vmatmul.msk.f32.vlgmr.msrb.gmra.mxu0 %vm390_vm1, %v835_v4 }
 0x2b4   :  { %v904_v6 = vpop.f32.mrf.mxu3 }
 0x2b5   :  { %1329 = vmatmul.msk.f32.gmra.mxu1 %vm390_vm1, %v904_v6 }
 0x2b7   :  { %v858_v9 = vpop.f32.mrf.mxu1  ;;  %v927_v10 = vpop.f32.mrf.mxu0 }
 0x2b8   :  { %1326 = vmatmul.msk.f32.gmra.mxu0 %vm390_vm1, %v858_v9  ;;  %1331 = vmatmul.msk.f32.vlgmr.msrb.gmra.mxu2 %vm390_vm1, %v927_v10 }
 0x2c3   :  { %v973_v11 = vpop.f32.mrf.mxu2 }
 0x2c4   :  { %1334 = vmatmul.msk.f32.vlgmr.msrb.gmra.mxu3 %vm390_vm1, %v973_v11 }
 0x2c5   :  { %v950_v12 = vpop.f32.mrf.mxu1 }
 0x2c6   :  { %1332 = vmatmul.msk.f32.gmra.mxu2 %vm390_vm1, %v950_v12 }
 0x2cc   :  { %v996_v14 = vpop.f32.mrf.mxu3 }
 0x2cd   :  { %1335 = vmatmul.msk.f32.gmra.mxu3 %vm390_vm1, %v996_v14 }
 0x32a   :  { %v1056_v19 = vpop.f32.mrf.mxu1 }
 0x32d   :  { %v1023_v15 = vpop.f32.mrf.mxu0 }
 0x32e   :  { %v1029_v18 = vadd.f32 %v1023_v15, %v1521_v16 }
 0x330   :  { %v1062_v1 = vadd.f32 %v1056_v19, %v1029_v18 }
 0x332   :  { %v1059_v28 = vpop.f32.mrf.mxu1 }
 0x335   :  { %v1026_v23 = vpop.f32.mrf.mxu0 }
 0x336   :  { %v1030_v26 = vadd.f32 %v1026_v23, %v1580_v31  ;;  %v1415_v31 = vmov 32.0  }
 0x337   :  { %1378 = vrcp.f32 %v1415_v31 }
 0x338   :  { %v1063_v30 = vadd.f32 %v1059_v28, %v1030_v26 }
 0x33b   :  { %v1089_v20 = vpop.f32.mrf.mxu2 }
 0x33c   :  { %v1095_v2 = vadd.f32 %v1089_v20, %v1062_v1 }
 0x33d   :  { %v1379_v35 = vpop.eup %1378 }
 0x33e   :  { %v1137_v36 = vmul.f32 32.0, %v1379_v35  ;;  %vm1141_vm1 = vweird.f32 %v1379_v35 }
 0x340   :  { %v1138_v37 = vsub.f32 1.0, %v1137_v36 }
 0x342   :  { %v1139_v40 = vmul.f32 %v1379_v35, %v1138_v37 }
 0x344   :  { %v1140_v41 = vadd.f32 %v1379_v35, %v1139_v40 }
 0x346   :  { %v1142_v42 = vsel %vm1141_vm1, %v1379_v35, %v1140_v41 }
 0x347   :  { %v1122_v24 = vpop.f32.mrf.mxu3 }
 0x348   :  { %v1128_v25 = vadd.f32 %v1122_v24, %v1095_v2 }
 0x349   :  { %v1092_v29 = vpop.f32.mrf.mxu2 }
 0x34a   :  { %v1130_v27 = vsel %vm42_vm0, %v1128_v25, 0.0  ;;  %v1096_v32 = vadd.f32 %v1092_v29, %v1063_v30 }
 0x34b   :  { %1131 = vadd.xlane.f32.xlu1 %v1130_v27 }
 0x350   :  { %v1125_v33 = vpop.f32.mrf.mxu3 }
 0x351   :  { %v1129_v34 = vadd.f32 %v1125_v33, %v1096_v32 }
 0x353   :  { %v1133_v16 = vsel %vm42_vm0, %v1129_v34, 0.0 }
 0x354   :  { %1134 = vadd.xlane.f32.xlu2 %v1133_v16 }
 0x364   :  { %1194 = vrot.lane.b32.xlu1 %v1798_v13, %s1411_s6 }
 0x36c   :  { %1184 = vrot.lane.b32.xlu2 %v1816_v38, %s1412_s24 }
 0x374   :  { %1199 = vrot.lane.b32.xlu2 %v1819_v39, %s1413_s5 }
 0x37c   :  { %1209 = vrot.lane.b32.xlu2 %v1827_v47, %s1414_s25 }
 0x3be   :  { %v1132_v13 = vpop.xlane.xlu1 %1131 }
 0x3bf   :  { %v1143_v43 = vmul.f32 %v1142_v42, %v1132_v13 }
 0x3c1   :  { %v1145_v44 = vsub.f32 %v1128_v25, %v1143_v43 }
 0x3c3   :  { %v1147_v8 = vmul.f32 %v1145_v44, %v1145_v44 }
 0x3c5   :  { %v1149_v38 = vsel %vm42_vm0, %v1147_v8, 0.0 }
 0x3c6   :  { %1150 = vadd.xlane.f32.xlu0 %v1149_v38 }
 0x3c7   :  { %v1135_v39 = vpop.xlane.xlu2 %1134 }
 0x3c8   :  { %v1144_v45 = vmul.f32 %v1142_v42, %v1135_v39 }
 0x3ca   :  { %v1146_v46 = vsub.f32 %v1129_v34, %v1144_v45 }
 0x3cc   :  { %v1148_v7 = vmul.f32 %v1146_v46, %v1146_v46 }
 0x3ce   :  { %v1152_v47 = vsel %vm42_vm0, %v1148_v7, 0.0 }
 0x3cf   :  { %1153 = vadd.xlane.f32.xlu1 %v1152_v47  ;;  %v1185_v48 = vpop.permute.xlu2 %1184 }
 0x3d0   :  { %1188 = vst.msk [vmem:[%s1910_s9] sm:$0xff] %vm1187_vm14, %v1185_v48 }
 0x3d1   :  { %1193 = vst.msk [vmem:[%s1910_s9] sm:$0xff] %vm1192_vm15, %v1190_v49 }
 0x3d6   :  { %v1195_v50 = vpop.permute.xlu1 %1194 }
 0x3d7   :  { %1198 = vst.msk [vmem:[%s1910_s9] sm:$0xff] %vm1197_vm2, %v1195_v50  ;;  %v1200_v51 = vpop.permute.xlu2 %1199 }
 0x3d8   :  { %1203 = vst.msk [vmem:[%s1910_s9] sm:$0xff] %vm1202_vm3, %v1200_v51 }
 0x3da   :  { %1204 = vrot.lane.b32.xlu0 %v1832_v62, %s1416_s13 }
 0x3df   :  { %v1210_v3 = vpop.permute.xlu2 %1209 }
 0x3e8   :  { %1214 = vrot.lane.b32.xlu1 %v1837_v0, %s1417_s14 }
 0x439   :  { %v1151_v52 = vpop.xlane.xlu0 %1150 }
 0x43a   :  { %v1155_v53 = vmul.f32 %v1151_v52, %v1142_v42 }
 0x43c   :  { %v1157_v54 = vadd.f32 1e-05, %v1155_v53 }
 0x43e   :  { %1380 = vrsqrt.f32 %v1157_v54  ;;  %vm1165_vm7 = vweird.f32 %v1157_v54 }
 0x442   :  { %v1154_v55 = vpop.xlane.xlu1 %1153 }
 0x443   :  { %v1156_v58 = vmul.f32 %v1154_v55, %v1142_v42 }
 0x444   :  { %v1381_v56 = vpop.eup %1380 }
 0x445   :  { %v1160_v17 = vmul.f32 %v1381_v56, %v1157_v54  ;;  %v1158_v59 = vadd.f32 1e-05, %v1156_v58  ;;  %vm1166_vm5 = vweird.f32 %v1381_v56 }
 0x446   :  { %vm1167_vm8 = vmor %vm1165_vm7, %vm1166_vm5 }
 0x447   :  { %v1161_v60 = vmul.f32 %v1381_v56, %v1160_v17  ;;  %1382 = vrsqrt.f32 %v1158_v59  ;;  %vm1175_vm10 = vweird.f32 %v1158_v59 }
 0x449   :  { %v1162_v61 = vmul.f32 0.5, %v1161_v60 }
 0x44b   :  { %v1163_v63 = vsub.f32 1.5, %v1162_v61 }
 0x44c   :  { %v1205_v62 = vpop.permute.xlu0 %1204 }
 0x44d   :  { %v1164_v21 = vmul.f32 %v1381_v56, %v1163_v63  ;;  %1208 = vst.msk [vmem:[%s1910_s9] sm:$0xff] %vm1207_vm4, %v1205_v62  ;;  %v1383_v0 = vpop.eup %1382 }
 0x44e   :  { %1213 = vst.msk [vmem:[%s1910_s9] sm:$0xff] %vm1212_vm6, %v1210_v3  ;;  %v1170_v22 = vmul.f32 %v1383_v0, %v1158_v59  ;;  %vm1176_vm9 = vweird.f32 %v1383_v0 }
 0x44f   :  { %v1168_v57 = vsel %vm1167_vm8, %v1381_v56, %v1164_v21  ;;  %vm1177_vm11 = vmor %vm1175_vm10, %vm1176_vm9 }
 0x450   :  { %v1179_v4 = vmul.f32 %v1168_v57, %v1145_v44  ;;  %v1171_v5 = vmul.f32 %v1383_v0, %v1170_v22 }
 0x452   :  { %1181 = vst.msk [vmem:[#allocation2] sm:$0xff] %vm42_vm0, %v1179_v4  ;;  %v1172_v6 = vmul.f32 0.5, %v1171_v5 }
 0x454   :  { %v1173_v9 = vsub.f32 1.5, %v1172_v6 }
 0x456   :  { %v1174_v10 = vmul.f32 %v1383_v0, %v1173_v9 }
 0x458   :  { %v1178_v11 = vsel %vm1177_vm11, %v1383_v0, %v1174_v10 }
 0x459   :  { %v1180_v12 = vmul.f32 %v1178_v11, %v1146_v46 }
 0x45a   :  { %v1215_v14 = vpop.permute.xlu1 %1214 }
 0x45b   :  { %1182 = vst.msk [vmem:[#allocation2 + $0x8] sm:$0xff] %vm42_vm0, %v1180_v12 }
 0x45c   :  { %1218 = vst.msk [vmem:[%s1910_s9] sm:$0xff] %vm1217_vm12, %v1215_v14 }
 0x45d   :  { %1231 = dma.vmem_to_hbm [thread:$0]  %s1224_s1, 256, %s1226_s3, [#allocation3], %s1419_s20, %s1419_s20, %s1412_s24  }
 0x45e   :  { %1408 = dma.done.wait [#allocation3], 256  }
 0x45f   :  { %1409 = vsyncadd [#allocation3], 4294967040 }
 0x460   :  { %1240 = vsyncpa [#allocation3], 1 }

</bundles_post_ra>
